<compile_context>
chip_gen: v6e
topology: v6e:2x2x1
jax: 0.10.0
libtpu: 0.0.40
codegen_flags: <defaults>
</compile_context>

<pallas_src>
import functools

import jax
import jax.numpy as jnp
import numpy as np
from jax.experimental import pallas as pl
from jax.experimental.pallas import tpu as pltpu


def _basic_block2_kernel(w_ref, rhs_ref, gamma_ref, beta_ref, out_ref, *,
                         eps, npix):
    # w_ref     : (Cout, 9*Cin)    conv weight, K ordered (kh, kw, cin)
    # rhs_ref   : (9*Cin, 4*npix)  im2col patches; lane axis = (quadrant, n, i, j)
    # gamma/beta: (Cout, 1)
    # out_ref   : (Cout, npix)     channel-major pooled output
    # One MXU contraction covers all 9 taps and all 4 pooling quadrants.
    conv = jnp.dot(w_ref[...], rhs_ref[...],
                   preferred_element_type=jnp.float32)          # (Cout, 4*npix)

    # maxpool(2,2): max over the 4 quadrant lane-blocks (each npix lanes wide).
    q0 = conv[:, 0 * npix:1 * npix]
    q1 = conv[:, 1 * npix:2 * npix]
    q2 = conv[:, 2 * npix:3 * npix]
    q3 = conv[:, 3 * npix:4 * npix]
    pooled = jnp.maximum(jnp.maximum(q0, q1), jnp.maximum(q2, q3))  # (Cout, npix)

    # BatchNorm2d, default training mode: per-channel batch stats over
    # (N, H, W), biased variance, eps from the ctor (= 1.0), affine; then ReLU.
    # Single reduction pass: var = E[x^2] - mean^2 (eps=1.0 dominates any
    # cancellation error).
    inv_cnt = 1.0 / float(npix)
    mean = jnp.sum(pooled, axis=1, keepdims=True) * inv_cnt           # (Cout, 1)
    mean_sq = jnp.sum(pooled * pooled, axis=1, keepdims=True) * inv_cnt
    var = mean_sq - mean * mean
    scale = gamma_ref[...] * jax.lax.rsqrt(var + eps)                 # (Cout, 1)
    shift = beta_ref[...] - mean * scale
    out_ref[...] = jnp.maximum(pooled * scale + shift, 0.0)


def basic_block2_forward(x_nchw, w_hwio, gamma, beta, *, eps=1.0,
                         matmul_dtype=jnp.float32):
    """BasicBlock2.forward with stride=1 (module default).

    x_nchw: (N, Cin, H, W). Returns (N, Cout, H//2, W//2) in NCHW.
    matmul_dtype: set to jnp.bfloat16 on v6e/v7x for 2x MXU throughput
    (accumulation stays f32); default f32 to match PyTorch f32 numerics.
    """
    n, cin, h, w = x_nchw.shape
    cout = w_hwio.shape[-1]
    assert h % 2 == 0 and w % 2 == 0, "maxpool(2,2) expects even spatial dims"
    hp, wp = h // 2, w // 2
    npix = n * hp * wp

    # Glue (one fused XLA producer): NCHW -> NHWC, pad=1, im2col in
    # channel-major orientation with the 4 pooling quadrants stacked along the
    # lane axis:  rhs[(kh*3+kw)*Cin + c, q*npix + pix] = xpad[n, 2i+py+kh, 2j+pw+kw, c]
    x = jnp.transpose(x_nchw, (0, 2, 3, 1)).astype(jnp.float32)       # NHWC
    xpad = jnp.pad(x, ((0, 0), (1, 1), (1, 1), (0, 0)))               # (N,H+2,W+2,Cin)

    quads = []
    for py in range(2):
        for pw in range(2):
            taps = []
            for kh in range(3):
                for kw in range(3):
                    sl = xpad[:, py + kh:py + kh + 2 * hp:2,
                              pw + kw:pw + kw + 2 * wp:2, :]           # (N,hp,wp,Cin)
                    taps.append(sl.reshape(npix, cin))                 # (npix, Cin)
            quads.append(jnp.concatenate(taps, axis=1))                # (npix, 9*Cin)
    rhs = jnp.concatenate(quads, axis=0).T.astype(matmul_dtype)        # (9*Cin, 4*npix)

    w_t = jnp.transpose(w_hwio.reshape(9 * cin, cout)).astype(matmul_dtype)  # (Cout, 9*Cin)
    gamma2 = gamma.reshape(cout, 1).astype(jnp.float32)
    beta2 = beta.reshape(cout, 1).astype(jnp.float32)

    kernel = functools.partial(_basic_block2_kernel, eps=eps, npix=npix)
    out_cm = pl.pallas_call(
        kernel,
        out_shape=jax.ShapeDtypeStruct((cout, npix), jnp.float32),
        in_specs=[pl.BlockSpec(memory_space=pltpu.MemorySpace.VMEM)
                  for _ in range(4)],
        out_specs=pl.BlockSpec(memory_space=pltpu.MemorySpace.VMEM),
    )(w_t, rhs, gamma2, beta2)

    out = out_cm.reshape(cout, n, hp, wp)          # channel-major -> NCHW
    return jnp.transpose(out, (1, 0, 2, 3))


def _reference(x_nchw, w_hwio, gamma, beta, eps=1.0):
    """Pure-JAX reference matching PyTorch semantics (training-mode BN)."""
    x = jnp.transpose(x_nchw, (0, 2, 3, 1)).astype(jnp.float32)
    conv = jax.lax.conv_general_dilated(
        x, w_hwio.astype(jnp.float32), window_strides=(1, 1),
        padding=((1, 1), (1, 1)),
        dimension_numbers=('NHWC', 'HWIO', 'NHWC'))
    pooled = jax.lax.reduce_window(conv, -jnp.inf, jax.lax.max,
                                   (1, 2, 2, 1), (1, 2, 2, 1), 'VALID')
    mean = jnp.mean(pooled, axis=(0, 1, 2), keepdims=True)
    var = jnp.mean((pooled - mean) ** 2, axis=(0, 1, 2), keepdims=True)
    y = (pooled - mean) * jax.lax.rsqrt(var + eps)
    y = y * gamma.reshape(1, 1, 1, -1) + beta.reshape(1, 1, 1, -1)
    y = jnp.maximum(y, 0.0)
    return jnp.transpose(y, (0, 3, 1, 2))


if __name__ == "__main__":
    # Small shapes consistent with the module: batch=2, in_planes=4, planes=8,
    # spatial=16, stride=1 (default).
    N, CIN, COUT, H, W = 2, 4, 8, 16, 16

    key = jax.random.PRNGKey(0)
    kx, kw, kg, kb = jax.random.split(key, 4)
    x = jax.random.normal(kx, (N, CIN, H, W), dtype=jnp.float32)
    # conv1 weight stored as HWIO (3, 3, Cin, Cout); PyTorch OIHW is just a
    # transpose of this.
    w_hwio = 0.1 * jax.random.normal(kw, (3, 3, CIN, COUT), dtype=jnp.float32)
    gamma = 1.0 + 0.1 * jax.random.normal(kg, (COUT,), dtype=jnp.float32)
    beta = 0.1 * jax.random.normal(kb, (COUT,), dtype=jnp.float32)

    out = basic_block2_forward(x, w_hwio, gamma, beta, eps=1.0)
    out = jax.block_until_ready(out)

    ref = jax.block_until_ready(_reference(x, w_hwio, gamma, beta, eps=1.0))
    np.testing.assert_allclose(np.asarray(out), np.asarray(ref),
                               rtol=1e-4, atol=1e-4)
    assert out.shape == (N, COUT, H // 2, W // 2)
    print("KERNEL_OK")
</pallas_src>

<mosaic_0001>
module attributes {stable_mosaic.version = 11 : i64} {
  func.func @_basic_block2_kernel(%arg0: memref<8x36xf32, #tpu.memory_space<vmem>>, %arg1: memref<36x512xf32, #tpu.memory_space<vmem>>, %arg2: memref<8x1xf32, #tpu.memory_space<vmem>>, %arg3: memref<8x1xf32, #tpu.memory_space<vmem>>, %arg4: memref<8x128xf32, #tpu.memory_space<vmem>>) attributes {dimension_semantics = [], scalar_prefetch = 0 : i64, scratch_operands = 0 : i64, tpu.core_type = #tpu.core_type<tc>} {
    %c0 = arith.constant 0 : index
    %c0_0 = arith.constant 0 : index
    %0 = vector.load %arg0[%c0, %c0_0] : memref<8x36xf32, #tpu.memory_space<vmem>>, vector<8x36xf32>
    %c0_1 = arith.constant 0 : index
    %c0_2 = arith.constant 0 : index
    %1 = vector.load %arg1[%c0_1, %c0_2] : memref<36x512xf32, #tpu.memory_space<vmem>>, vector<36x512xf32>
    %cst = arith.constant dense<0.000000e+00> : vector<8x512xf32>
    %2 = tpu.matmul %0, %1, %cst {dimension_numbers = #tpu.dot_dimension_numbers<[1], [0], [0], [1], [0, 0, 1, 1], [], []>} : vector<8x36xf32>, vector<36x512xf32>, vector<8x512xf32> -> vector<8x512xf32>
    %3 = vector.extract_strided_slice %2 {offsets = [0, 0], sizes = [8, 128], strides = [1, 1]} : vector<8x512xf32> to vector<8x128xf32>
    %4 = vector.extract_strided_slice %2 {offsets = [0, 128], sizes = [8, 128], strides = [1, 1]} : vector<8x512xf32> to vector<8x128xf32>
    %5 = vector.extract_strided_slice %2 {offsets = [0, 256], sizes = [8, 128], strides = [1, 1]} : vector<8x512xf32> to vector<8x128xf32>
    %6 = vector.extract_strided_slice %2 {offsets = [0, 384], sizes = [8, 128], strides = [1, 1]} : vector<8x512xf32> to vector<8x128xf32>
    %7 = arith.maximumf %3, %4 : vector<8x128xf32>
    %8 = arith.maximumf %5, %6 : vector<8x128xf32>
    %9 = arith.maximumf %7, %8 : vector<8x128xf32>
    %cst_3 = arith.constant dense<0.000000e+00> : vector<8xf32>
    %10 = vector.multi_reduction <add>, %9, %cst_3 [1] : vector<8x128xf32> to vector<8xf32>
    %11 = vector.shape_cast %10 : vector<8xf32> to vector<8x1xf32>
    %cst_4 = arith.constant 7.812500e-03 : f32
    %12 = vector.broadcast %cst_4 : f32 to vector<8x1xf32>
    %13 = arith.mulf %11, %12 : vector<8x1xf32>
    %14 = arith.mulf %9, %9 : vector<8x128xf32>
    %cst_5 = arith.constant dense<0.000000e+00> : vector<8xf32>
    %15 = vector.multi_reduction <add>, %14, %cst_5 [1] : vector<8x128xf32> to vector<8xf32>
    %16 = vector.shape_cast %15 : vector<8xf32> to vector<8x1xf32>
    %cst_6 = arith.constant 7.812500e-03 : f32
    %17 = vector.broadcast %cst_6 : f32 to vector<8x1xf32>
    %18 = arith.mulf %16, %17 : vector<8x1xf32>
    %19 = arith.mulf %13, %13 : vector<8x1xf32>
    %20 = arith.subf %18, %19 : vector<8x1xf32>
    %c0_7 = arith.constant 0 : index
    %c0_8 = arith.constant 0 : index
    %21 = vector.load %arg2[%c0_7, %c0_8] : memref<8x1xf32, #tpu.memory_space<vmem>>, vector<8x1xf32>
    %cst_9 = arith.constant 1.000000e+00 : f32
    %22 = vector.broadcast %cst_9 : f32 to vector<8x1xf32>
    %23 = arith.addf %20, %22 : vector<8x1xf32>
    %24 = math.rsqrt %23 : vector<8x1xf32>
    %25 = arith.mulf %21, %24 : vector<8x1xf32>
    %c0_10 = arith.constant 0 : index
    %c0_11 = arith.constant 0 : index
    %26 = vector.load %arg3[%c0_10, %c0_11] : memref<8x1xf32, #tpu.memory_space<vmem>>, vector<8x1xf32>
    %27 = arith.mulf %13, %25 : vector<8x1xf32>
    %28 = arith.subf %26, %27 : vector<8x1xf32>
    %29 = vector.broadcast %25 : vector<8x1xf32> to vector<8x128xf32>
    %30 = arith.mulf %9, %29 : vector<8x128xf32>
    %31 = vector.broadcast %28 : vector<8x1xf32> to vector<8x128xf32>
    %32 = arith.addf %30, %31 : vector<8x128xf32>
    %cst_12 = arith.constant 0.000000e+00 : f32
    %33 = vector.broadcast %cst_12 : f32 to vector<8x128xf32>
    %34 = arith.maximumf %32, %33 : vector<8x128xf32>
    %c0_13 = arith.constant 0 : index
    %c0_14 = arith.constant 0 : index
    %35 = vector.load %arg4[%c0_13, %c0_14] : memref<8x128xf32, #tpu.memory_space<vmem>>, vector<8x128xf32>
    tpu.vector_store %arg4[%c0_13, %c0_14], %34 {strides = array<i32>} : memref<8x128xf32, #tpu.memory_space<vmem>>, vector<8x128xf32>,
    return
  }
}

</mosaic_0001>

<bundles_post_ra>
// kernel: tpu_custom_call.1
= control target key start
LH: loop header
LB: loop body
LE: loop exit
PB: predicated region body
PF: predicated region fallthrough
CT: control target
= control target key end

     0   :  { %9 = vsyncpa [#allocation3], 0  ;;  %s366_s0 = inlined_call_operand.vmem [shape: f32[8,36], index: 0, kind: input, shape index: {}]   ;;  %s367_s1 = inlined_call_operand.hbm [shape: f32[36,512], index: 1, kind: input, shape index: {}]   ;;  %s368_s2 = inlined_call_operand.vmem [shape: f32[8,1], index: 2, kind: input, shape index: {}]   ;;  %s369_s3 = inlined_call_operand.vmem [shape: f32[8,1], index: 3, kind: input, shape index: {}]   ;;  %s370_s4 = inlined_call_operand.hbm [shape: f32[8,128], index: 4, kind: output, shape index: {}]  }
   0x1   :  { %10 = vsyncpa [#allocation4], 0  ;;  %s320_s15 = smov [#allocation2]  }
   0x2   :  { %s18_s16 = sshll.u32 %s320_s15, 4  ;;  %s19_s16 = int_to_ptr.vmem [resolvable:$true] %s18_s16 }
   0x3   :  { %s284_s17 = scalar_lea.vmem %s19_s16, 2560  ;;  %p289_p1 = scmp.lt.s32.totalorder %s19_s16, %s19_s16 }
   0x4   :  { %p285_p0 = scmp.ne.s32.totalorder %s19_s16, %s284_s17  ;;  %p290_p2 = scmp.lt.s32.totalorder %s284_s17, %s284_s17 }
   0x6   :  { %p291_p3 = por %p290_p2, %p289_p1 }
   0x8   :  { %p292_p4 = pnand %p291_p3, %p285_p0 }
   0xa   :  { %295 = shalt.err (!%p292_p4)
}
   0xb   :  { %s321_s18 = smov 512   ;;  %s322_s19 = smov 32  }
   0xc   :  { %24 = dma.hbm_to_vmem [thread:$0]  %s367_s1, 2560, %s19_s16, [#allocation3], %s321_s18, %s321_s18, %s322_s19  }
   0xd   :  { %316 = dma.done.wait [#allocation3], 2560  }
   0xe   :  { %317 = vsyncadd [#allocation3], 4294964736  ;;  %v323_v0 = vmov 0.0   ;;  %vm57_vm0 = vcmask 1043456   ;;  %v50_v1 = vld [vmem:[#allocation2 + $0x88] sm:$0xf] }
   0xf   :  { %134 = vmatprep.mubr.f32.mxu0 %v323_v0  ;;  %205 = vmatprep.mubr.f32.mxu1 %v323_v0  ;;  %v52_v2 = vld [vmem:[#allocation2 + $0x98] sm:$0xf]  ;;  %v49_v3 = vld [vmem:[#allocation2 + $0x80] sm:$0xf]  ;;  %v51_v4 = vld [vmem:[#allocation2 + $0x90] sm:$0xf] }
  0x10   :  { %260 = vmatprep.subr.msk.mxu0 %vm57_vm0, %v50_v1  ;;  %263 = vmatprep.subr.msk.mxu1 %vm57_vm0, %v52_v2  ;;  %v46_v5 = vld [vmem:[#allocation2 + $0x68] sm:$0xff]  ;;  %v48_v6 = vld [vmem:[#allocation2 + $0x78] sm:$0xff]  ;;  %v45_v7 = vld [vmem:[#allocation2 + $0x60] sm:$0xff]  ;;  %vm53_vm1 = vcmask 293888   ;;  %v324_v30 = vmov 0   ;;  %s325_s26 = smov [#allocation5]  }
  0x11   :  { %261 = vmatpush1.msk.msra.mxu0 %vm57_vm0, %v49_v3  ;;  %264 = vmatpush1.msk.msra.mxu1 %vm57_vm0, %v51_v4  ;;  %v47_v8 = vld [vmem:[#allocation2 + $0x70] sm:$0xff]  ;;  %v42_v9 = vld [vmem:[#allocation2 + $0x48] sm:$0xff]  ;;  %v44_v10 = vld [vmem:[#allocation2 + $0x58] sm:$0xff]  ;;  %s251_s27 = sshll.u32 %s325_s26, 4  ;;  %s252_s27 = int_to_ptr.vmem [resolvable:$true] %s251_s27 }
  0x12   :  { %94 = vmatprep.subr.mxu0 %v46_v5  ;;  %165 = vmatprep.subr.mxu1 %v48_v6  ;;  %v41_v11 = vld [vmem:[#allocation2 + $0x40] sm:$0xff]  ;;  %v43_v12 = vld [vmem:[#allocation2 + $0x50] sm:$0xff]  ;;  %v38_v13 = vld [vmem:[#allocation2 + $0x28] sm:$0xff]  ;;  %p301_p6 = scmp.lt.s32.totalorder %s252_s27, %s252_s27 }
  0x13   :  { %95 = vmatpush1.msra.mxu0 %v45_v7  ;;  %166 = vmatpush1.msra.mxu1 %v47_v8  ;;  %v40_v14 = vld [vmem:[#allocation2 + $0x38] sm:$0xff]  ;;  %v37_v15 = vld [vmem:[#allocation2 + $0x20] sm:$0xff]  ;;  %v39_v16 = vld [vmem:[#allocation2 + $0x30] sm:$0xff] }
  0x14   :  { %96 = vmatprep.subr.mxu0 %v42_v9  ;;  %167 = vmatprep.subr.mxu1 %v44_v10  ;;  %v34_v17 = vld [vmem:[#allocation2 + $0x8] sm:$0xff]  ;;  %v36_v18 = vld [vmem:[#allocation2 + $0x18] sm:$0xff]  ;;  %v33_v19 = vld [vmem:[#allocation2] sm:$0xff] }
  0x15   :  { %97 = vmatpush1.msra.mxu0 %v41_v11  ;;  %168 = vmatpush1.msra.mxu1 %v43_v12  ;;  %v35_v20 = vld [vmem:[#allocation2 + $0x10] sm:$0xff]  ;;  %v32_v21 = vld [vmem:[%s366_s0] sm:$0xff] }
  0x16   :  { %98 = vmatprep.subr.mxu0 %v38_v13  ;;  %169 = vmatprep.subr.mxu1 %v40_v14  ;;  %v224_v38 = vld [vmem:[%s368_s2] sm:$0xff]  ;;  %s296_s2 = scalar_lea.vmem %s252_s27, 128 }
  0x17   :  { %99 = vmatpush1.msra.mxu0 %v37_v15  ;;  %170 = vmatpush1.msra.mxu1 %v39_v16  ;;  %v228_v41 = vld [vmem:[%s369_s3] sm:$0xff]  ;;  %p297_p5 = scmp.ne.s32.totalorder %s252_s27, %s296_s2  ;;  %p302_p7 = scmp.lt.s32.totalorder %s296_s2, %s296_s2 }
  0x18   :  { %100 = vmatprep.subr.mxu0 %v34_v17  ;;  %171 = vmatprep.subr.mxu1 %v36_v18 }
  0x19   :  { %101 = vmatpush1.msra.mxu0 %v33_v19  ;;  %172 = vmatpush1.msra.mxu1 %v35_v20  ;;  %p303_p8 = por %p302_p7, %p301_p6 }
  0x1a   :  { %262 = vmatmul.mubr.msk.f32.vlgmr.msra.gmra.mxu0 %vm53_vm1, %v32_v21  ;;  %265 = vmatmul.mubr.msk.f32.vlgmr.msra.gmra.mxu1 %vm53_vm1, %v32_v21 }
  0x1b   :  { %272 = vset.pattern.permute.xlu1 %v324_v30  ;;  %273 = vset.pattern.permute.xlu0 %v324_v30  ;;  %p304_p9 = pnand %p303_p8, %p297_p5 }
  0xda   :  { %v136_v22 = vpop.f32.mrf.mxu0  ;;  %v207_v23 = vpop.f32.mrf.mxu1 }
  0xdc   :  { %v138_v24 = vpop.f32.mrf.mxu0  ;;  %v209_v25 = vpop.f32.mrf.mxu1 }
  0xdd   :  { %v212_v26 = vmax.f32 %v136_v22, %v138_v24  ;;  %v213_v27 = vmax.f32 %v207_v23, %v209_v25 }
  0xdf   :  { %v214_v28 = vmax.f32 %v212_v26, %v213_v27 }
  0xe1   :  { %215 = vadd.xlane.f32.xlu0 %v214_v28  ;;  %v218_v29 = vmul.f32 %v214_v28, %v214_v28 }
  0xe5   :  { %219 = vadd.xlane.f32.xlu0 %v218_v29 }
 0x16a   :  { %v216_v31 = vpop.xlane.xlu0 %215 }
 0x16b   :  { %v217_v32 = vmul.f32 0.0078125, %v216_v31 }
 0x16d   :  { %v222_v34 = vmul.f32 %v217_v32, %v217_v32 }
 0x16e   :  { %v220_v33 = vpop.xlane.xlu0 %219 }
 0x16f   :  { %v221_v35 = vmul.f32 0.0078125, %v220_v33 }
 0x171   :  { %v223_v36 = vsub.f32 %v221_v35, %v222_v34 }
 0x173   :  { %v225_v37 = vadd.f32 1.0, %v223_v36 }
 0x175   :  { %274 = vrsqrt.f32 %v225_v37 }
 0x182   :  { %v275_v39 = vpop.eup %274 }
 0x183   :  { %v227_v40 = vmul.f32 %v275_v39, %v224_v38 }
 0x185   :  { %233 = vperm.xlu1 %272, %v227_v40   ;;  %v229_v42 = vmul.f32 %v227_v40, %v217_v32 }
 0x187   :  { %v230_v43 = vsub.f32 %v228_v41, %v229_v42 }
 0x189   :  { %239 = vperm.xlu1 %272, %v230_v43  }
 0x200   :  { %v234_v44 = vpop.permute.xlu1 %233 }
 0x201   :  { %v236_v45 = vmul.f32 %v234_v44, %v214_v28 }
 0x204   :  { %v240_v46 = vpop.permute.xlu1 %239 }
 0x205   :  { %v242_v47 = vadd.f32 %v240_v46, %v236_v45 }
 0x207   :  { %v243_v48 = vmax.f32 %v242_v47, 0.0 }
 0x209   :  { %244 = vst [vmem:[#allocation5] sm:$0xff] %v243_v48 }
 0x20a   :  { %307 = shalt.err (!%p304_p9)
}
 0x20b   :  { %254 = dma.vmem_to_hbm [thread:$0]  %s252_s27, 128, %s370_s4, [#allocation4]  }
 0x20c   :  { %318 = dma.done.wait [#allocation4], 128  }
 0x20d   :  { %319 = vsyncadd [#allocation4], 4294967168 }
 0x20e   :  { %258 = vsyncpa [#allocation3], 1 }
 0x20f   :  { %259 = vsyncpa [#allocation4], 1 }

</bundles_post_ra>
